<compile_context>
chip_gen: v7x
topology: tpu7x:2x2x1
jax: 0.10.0
libtpu: 0.0.40
codegen_flags: <defaults>
</compile_context>

<pallas_src>
import functools

import jax
import jax.numpy as jnp
from jax import lax
from jax.experimental import pallas as pl
from jax.experimental.pallas import tpu as pltpu

LN_EPS = 1e-5  # PyTorch nn.LayerNorm default


# ----------------------------------------------------------------------------
# Fused kernel: one grid step == one batch block (default: the whole batch).
#   x_ref     : (Bblk, N, D)       input
#   gamma/beta: (1, D)             LayerNorm affine
#   wqkv_ref  : (D, 3*inner)       QKV weight (already transposed)
#   wout_ref  : (inner, D)         output projection weight (already transposed)
#   out_ref   : (Bblk, N, D)       projected output
#   attn_ref  : (Bblk, N, H*N)     softmax attention maps, lane-dense slab
# ----------------------------------------------------------------------------
def _fused_attention_kernel(x_ref, gamma_ref, beta_ref, wqkv_ref, wout_ref,
                            out_ref, attn_ref, *, bblk, seq, heads, head_dim,
                            scale):
    B, N, H, hd = bblk, seq, heads, head_dim
    inner = H * hd
    D = x_ref.shape[-1]

    # ---- LayerNorm over all B*N rows at once (f32, VPU) ----
    x = x_ref[...].reshape(B * N, D)                           # (B*N, D)
    mu = jnp.mean(x, axis=-1, keepdims=True)
    var = jnp.mean((x - mu) ** 2, axis=-1, keepdims=True)
    xn = (x - mu) * lax.rsqrt(var + LN_EPS)
    xn = xn * gamma_ref[...] + beta_ref[...]                   # (B*N, D)

    # ---- QKV projection: one MXU matmul over the whole batch ----
    qkv = jnp.dot(xn, wqkv_ref[...],
                  preferred_element_type=jnp.float32)          # (B*N, 3*inner)

    attn_heads = []
    o_heads = []
    # Static head loop (fully unrolled); each step is batched over B via
    # dot_general batch dims, so there is no per-batch Python loop.
    for h in range(H):
        q = qkv[:, h * hd:(h + 1) * hd].reshape(B, N, hd)
        k = qkv[:, inner + h * hd:inner + (h + 1) * hd].reshape(B, N, hd)
        v = qkv[:, 2 * inner + h * hd:2 * inner + (h + 1) * hd].reshape(B, N, hd)

        # q @ k^T contracted over the head dim, batched over B -> (B, N, N)
        dots = lax.dot_general(
            q, k, (((2,), (2,)), ((0,), (0,))),
            preferred_element_type=jnp.float32) * scale

        dots = dots - jnp.max(dots, axis=-1, keepdims=True)
        e = jnp.exp(dots)
        attn = e / jnp.sum(e, axis=-1, keepdims=True)          # (B, N, N)
        attn_heads.append(attn)

        # attn @ v, batched over B -> (B, N, hd)
        o_heads.append(lax.dot_general(
            attn, v, (((2,), (1,)), ((0,), (0,))),
            preferred_element_type=jnp.float32))

    # ---- single lane-dense store of the attention maps ----
    attn_ref[...] = jnp.concatenate(attn_heads, axis=-1)       # (B, N, H*N)

    # ---- fold all head projections into ONE matmul ----
    o = jnp.concatenate(o_heads, axis=-1).reshape(B * N, inner)  # (B*N, inner)
    out = jnp.dot(o, wout_ref[...],
                  preferred_element_type=jnp.float32)            # (B*N, D)
    out_ref[...] = out.reshape(B, N, D)


# ----------------------------------------------------------------------------
# Wrapper
# ----------------------------------------------------------------------------
def attention_forward(x, params, *, heads, head_dim, batch_blocks=1):
    """x: (B, N, D) float32. Returns (out (B, N, D), attn (B, H, N, N)).

    batch_blocks=1 is best on single-TensorCore v5e/v6e; batch_blocks=2 shards
    the batch across the two TensorCores of v7x.
    """
    B, N, D = x.shape
    H, hd = heads, head_dim
    inner = H * hd
    scale = head_dim ** (-0.5)

    assert B % batch_blocks == 0
    bblk = B // batch_blocks

    gamma = params["ln_gamma"].reshape(1, D)
    beta = params["ln_beta"].reshape(1, D)
    wqkv_t = params["w_qkv"].T                        # (D, 3*inner)
    wout_t = params["w_out"].T                        # (inner, D)

    kernel = functools.partial(_fused_attention_kernel,
                               bblk=bblk, seq=N, heads=H, head_dim=hd,
                               scale=scale)

    out, attn_slab = pl.pallas_call(
        kernel,
        out_shape=(
            jax.ShapeDtypeStruct((B, N, D), jnp.float32),
            jax.ShapeDtypeStruct((B, N, H * N), jnp.float32),
        ),
        grid=(batch_blocks,),
        in_specs=[
            pl.BlockSpec((bblk, N, D), lambda b: (b, 0, 0)),       # x
            pl.BlockSpec((1, D), lambda b: (0, 0)),                # gamma
            pl.BlockSpec((1, D), lambda b: (0, 0)),                # beta
            pl.BlockSpec((D, 3 * inner), lambda b: (0, 0)),        # W_qkv^T
            pl.BlockSpec((inner, D), lambda b: (0, 0)),            # W_out^T
        ],
        out_specs=(
            pl.BlockSpec((bblk, N, D), lambda b: (b, 0, 0)),
            pl.BlockSpec((bblk, N, H * N), lambda b: (b, 0, 0)),
        ),
        compiler_params=pltpu.CompilerParams(
            dimension_semantics=("parallel",)),
    )(x, gamma, beta, wqkv_t, wout_t)

    # Reshape the lane-dense attention slab back to (B, H, N, N) in XLA.
    attn = attn_slab.reshape(B, N, H, N).transpose(0, 2, 1, 3)
    return out, attn


# ----------------------------------------------------------------------------
# Pure-JAX reference (sanity check)
# ----------------------------------------------------------------------------
def attention_ref(x, params, *, heads, head_dim):
    B, N, D = x.shape
    H, hd = heads, head_dim
    scale = head_dim ** (-0.5)
    mu = jnp.mean(x, axis=-1, keepdims=True)
    var = jnp.mean((x - mu) ** 2, axis=-1, keepdims=True)
    xn = (x - mu) / jnp.sqrt(var + LN_EPS) * params["ln_gamma"] + params["ln_beta"]
    qkv = xn @ params["w_qkv"].T
    q, k, v = jnp.split(qkv, 3, axis=-1)

    def to_heads(t):
        return t.reshape(B, N, H, hd).transpose(0, 2, 1, 3)

    q, k, v = map(to_heads, (q, k, v))
    dots = jnp.einsum("bhnd,bhmd->bhnm", q, k) * scale
    attn = jax.nn.softmax(dots, axis=-1)
    o = jnp.einsum("bhnm,bhmd->bhnd", attn, v)
    o = o.transpose(0, 2, 1, 3).reshape(B, N, H * hd)
    return o @ params["w_out"].T, attn


if __name__ == "__main__":
    B, N, D = 2, 8, 32
    heads, head_dim = 4, 8
    inner = heads * head_dim
    # project_out = not (heads == 1 and head_dim == dim) -> True for this config.

    key = jax.random.PRNGKey(0)
    kx, kq, ko = jax.random.split(key, 3)

    x = jax.random.normal(kx, (B, N, D), dtype=jnp.float32)
    params = {
        # nn.LayerNorm defaults: weight=1, bias=0
        "ln_gamma": jnp.ones((D,), dtype=jnp.float32),
        "ln_beta": jnp.zeros((D,), dtype=jnp.float32),
        # nn.Linear(dim, inner*3, bias=False).weight: (3*inner, D)
        "w_qkv": jax.random.normal(kq, (3 * inner, D), dtype=jnp.float32) * 0.05,
        # nn.Linear(inner, dim, bias=False).weight: (D, inner)
        "w_out": jax.random.normal(ko, (D, inner), dtype=jnp.float32) * 0.05,
    }

    out, attn = attention_forward(x, params, heads=heads, head_dim=head_dim,
                                  batch_blocks=1)
    out, attn = jax.block_until_ready((out, attn))

    out_r, attn_r = attention_ref(x, params, heads=heads, head_dim=head_dim)
    assert out.shape == (B, N, D) and attn.shape == (B, heads, N, N)
    assert jnp.allclose(out, out_r, atol=1e-4, rtol=1e-4)
    assert jnp.allclose(attn, attn_r, atol=1e-4, rtol=1e-4)

    print("KERNEL_OK")
</pallas_src>

<mosaic_0001>
module attributes {stable_mosaic.version = 11 : i64} {
  func.func @_fused_attention_kernel(%arg0: i32, %arg1: memref<2x8x32xf32, #tpu.memory_space<vmem>>, %arg2: memref<1x32xf32, #tpu.memory_space<vmem>>, %arg3: memref<1x32xf32, #tpu.memory_space<vmem>>, %arg4: memref<32x96xf32, #tpu.memory_space<vmem>>, %arg5: memref<32x32xf32, #tpu.memory_space<vmem>>, %arg6: memref<2x8x32xf32, #tpu.memory_space<vmem>>, %arg7: memref<2x8x32xf32, #tpu.memory_space<vmem>>) attributes {dimension_semantics = [#tpu.dimension_semantics<parallel>], iteration_bounds = array<i64: 1>, scalar_prefetch = 0 : i64, scratch_operands = 0 : i64, tpu.core_type = #tpu.core_type<tc>, window_params = [{transform_indices = @transform_0, window_bounds = array<i64: 2, 8, 32>}, {pipeline_mode = #tpu.pipeline_mode<synchronous>, transform_indices = @transform_1, window_bounds = array<i64: 1, 32>}, {pipeline_mode = #tpu.pipeline_mode<synchronous>, transform_indices = @transform_2, window_bounds = array<i64: 1, 32>}, {pipeline_mode = #tpu.pipeline_mode<synchronous>, transform_indices = @transform_3, window_bounds = array<i64: 32, 96>}, {pipeline_mode = #tpu.pipeline_mode<synchronous>, transform_indices = @transform_4, window_bounds = array<i64: 32, 32>}, {transform_indices = @transform_5, window_bounds = array<i64: 2, 8, 32>}, {transform_indices = @transform_6, window_bounds = array<i64: 2, 8, 32>}]} {
    %c0 = arith.constant 0 : index
    %c0_0 = arith.constant 0 : index
    %c0_1 = arith.constant 0 : index
    %0 = vector.load %arg1[%c0, %c0_0, %c0_1] : memref<2x8x32xf32, #tpu.memory_space<vmem>>, vector<2x8x32xf32>
    %1 = vector.shape_cast %0 : vector<2x8x32xf32> to vector<16x32xf32>
    %cst = arith.constant dense<0.000000e+00> : vector<16xf32>
    %2 = vector.multi_reduction <add>, %1, %cst [1] : vector<16x32xf32> to vector<16xf32>
    %3 = vector.shape_cast %2 : vector<16xf32> to vector<16x1xf32>
    %cst_2 = arith.constant 3.200000e+01 : f32
    %4 = vector.broadcast %cst_2 : f32 to vector<16x1xf32>
    %5 = arith.divf %3, %4 : vector<16x1xf32>
    %6 = vector.broadcast %5 : vector<16x1xf32> to vector<16x32xf32>
    %7 = arith.subf %1, %6 : vector<16x32xf32>
    %8 = arith.mulf %7, %7 : vector<16x32xf32>
    %cst_3 = arith.constant dense<0.000000e+00> : vector<16xf32>
    %9 = vector.multi_reduction <add>, %8, %cst_3 [1] : vector<16x32xf32> to vector<16xf32>
    %10 = vector.shape_cast %9 : vector<16xf32> to vector<16x1xf32>
    %cst_4 = arith.constant 3.200000e+01 : f32
    %11 = vector.broadcast %cst_4 : f32 to vector<16x1xf32>
    %12 = arith.divf %10, %11 : vector<16x1xf32>
    %13 = vector.broadcast %5 : vector<16x1xf32> to vector<16x32xf32>
    %14 = arith.subf %1, %13 : vector<16x32xf32>
    %cst_5 = arith.constant 9.99999974E-6 : f32
    %15 = vector.broadcast %cst_5 : f32 to vector<16x1xf32>
    %16 = arith.addf %12, %15 : vector<16x1xf32>
    %17 = math.rsqrt %16 : vector<16x1xf32>
    %18 = vector.broadcast %17 : vector<16x1xf32> to vector<16x32xf32>
    %19 = arith.mulf %14, %18 : vector<16x32xf32>
    %c0_6 = arith.constant 0 : index
    %c0_7 = arith.constant 0 : index
    %20 = vector.load %arg2[%c0_6, %c0_7] : memref<1x32xf32, #tpu.memory_space<vmem>>, vector<1x32xf32>
    %21 = vector.broadcast %20 : vector<1x32xf32> to vector<16x32xf32>
    %22 = arith.mulf %19, %21 : vector<16x32xf32>
    %c0_8 = arith.constant 0 : index
    %c0_9 = arith.constant 0 : index
    %23 = vector.load %arg3[%c0_8, %c0_9] : memref<1x32xf32, #tpu.memory_space<vmem>>, vector<1x32xf32>
    %24 = vector.broadcast %23 : vector<1x32xf32> to vector<16x32xf32>
    %25 = arith.addf %22, %24 : vector<16x32xf32>
    %c0_10 = arith.constant 0 : index
    %c0_11 = arith.constant 0 : index
    %26 = vector.load %arg4[%c0_10, %c0_11] : memref<32x96xf32, #tpu.memory_space<vmem>>, vector<32x96xf32>
    %cst_12 = arith.constant dense<0.000000e+00> : vector<16x96xf32>
    %27 = tpu.matmul %25, %26, %cst_12 {dimension_numbers = #tpu.dot_dimension_numbers<[1], [0], [0], [1], [0, 0, 1, 1], [], []>} : vector<16x32xf32>, vector<32x96xf32>, vector<16x96xf32> -> vector<16x96xf32>
    %28 = vector.extract_strided_slice %27 {offsets = [0, 0], sizes = [16, 8], strides = [1, 1]} : vector<16x96xf32> to vector<16x8xf32>
    %29 = vector.shape_cast %28 : vector<16x8xf32> to vector<2x8x8xf32>
    %30 = vector.extract_strided_slice %27 {offsets = [0, 32], sizes = [16, 8], strides = [1, 1]} : vector<16x96xf32> to vector<16x8xf32>
    %31 = vector.shape_cast %30 : vector<16x8xf32> to vector<2x8x8xf32>
    %32 = vector.extract_strided_slice %27 {offsets = [0, 64], sizes = [16, 8], strides = [1, 1]} : vector<16x96xf32> to vector<16x8xf32>
    %33 = vector.shape_cast %32 : vector<16x8xf32> to vector<2x8x8xf32>
    %cst_13 = arith.constant dense<0.000000e+00> : vector<2x8x8xf32>
    %34 = tpu.matmul %29, %31, %cst_13 {dimension_numbers = #tpu.dot_dimension_numbers<[2], [2], [1], [1], [0, 0, 0, 1, 1, 1], [0], [0]>} : vector<2x8x8xf32>, vector<2x8x8xf32>, vector<2x8x8xf32> -> vector<2x8x8xf32>
    %cst_14 = arith.constant 0.353553385 : f32
    %35 = vector.broadcast %cst_14 : f32 to vector<2x8x8xf32>
    %36 = arith.mulf %34, %35 : vector<2x8x8xf32>
    %cst_15 = arith.constant dense<0xFF800000> : vector<2x8xf32>
    %37 = vector.multi_reduction <maximumf>, %36, %cst_15 [2] : vector<2x8x8xf32> to vector<2x8xf32>
    %38 = vector.shape_cast %37 : vector<2x8xf32> to vector<2x8x1xf32>
    %39 = vector.broadcast %38 : vector<2x8x1xf32> to vector<2x8x8xf32>
    %40 = arith.subf %36, %39 : vector<2x8x8xf32>
    %41 = math.exp %40 : vector<2x8x8xf32>
    %cst_16 = arith.constant dense<0.000000e+00> : vector<2x8xf32>
    %42 = vector.multi_reduction <add>, %41, %cst_16 [2] : vector<2x8x8xf32> to vector<2x8xf32>
    %43 = vector.shape_cast %42 : vector<2x8xf32> to vector<2x8x1xf32>
    %44 = vector.broadcast %43 : vector<2x8x1xf32> to vector<2x8x8xf32>
    %45 = arith.divf %41, %44 : vector<2x8x8xf32>
    %cst_17 = arith.constant dense<0.000000e+00> : vector<2x8x8xf32>
    %46 = tpu.matmul %45, %33, %cst_17 {dimension_numbers = #tpu.dot_dimension_numbers<[2], [1], [1], [2], [0, 0, 0, 1, 1, 2], [0], [0]>} : vector<2x8x8xf32>, vector<2x8x8xf32>, vector<2x8x8xf32> -> vector<2x8x8xf32>
    %47 = vector.extract_strided_slice %27 {offsets = [0, 8], sizes = [16, 8], strides = [1, 1]} : vector<16x96xf32> to vector<16x8xf32>
    %48 = vector.shape_cast %47 : vector<16x8xf32> to vector<2x8x8xf32>
    %49 = vector.extract_strided_slice %27 {offsets = [0, 40], sizes = [16, 8], strides = [1, 1]} : vector<16x96xf32> to vector<16x8xf32>
    %50 = vector.shape_cast %49 : vector<16x8xf32> to vector<2x8x8xf32>
    %51 = vector.extract_strided_slice %27 {offsets = [0, 72], sizes = [16, 8], strides = [1, 1]} : vector<16x96xf32> to vector<16x8xf32>
    %52 = vector.shape_cast %51 : vector<16x8xf32> to vector<2x8x8xf32>
    %cst_18 = arith.constant dense<0.000000e+00> : vector<2x8x8xf32>
    %53 = tpu.matmul %48, %50, %cst_18 {dimension_numbers = #tpu.dot_dimension_numbers<[2], [2], [1], [1], [0, 0, 0, 1, 1, 1], [0], [0]>} : vector<2x8x8xf32>, vector<2x8x8xf32>, vector<2x8x8xf32> -> vector<2x8x8xf32>
    %cst_19 = arith.constant 0.353553385 : f32
    %54 = vector.broadcast %cst_19 : f32 to vector<2x8x8xf32>
    %55 = arith.mulf %53, %54 : vector<2x8x8xf32>
    %cst_20 = arith.constant dense<0xFF800000> : vector<2x8xf32>
    %56 = vector.multi_reduction <maximumf>, %55, %cst_20 [2] : vector<2x8x8xf32> to vector<2x8xf32>
    %57 = vector.shape_cast %56 : vector<2x8xf32> to vector<2x8x1xf32>
    %58 = vector.broadcast %57 : vector<2x8x1xf32> to vector<2x8x8xf32>
    %59 = arith.subf %55, %58 : vector<2x8x8xf32>
    %60 = math.exp %59 : vector<2x8x8xf32>
    %cst_21 = arith.constant dense<0.000000e+00> : vector<2x8xf32>
    %61 = vector.multi_reduction <add>, %60, %cst_21 [2] : vector<2x8x8xf32> to vector<2x8xf32>
    %62 = vector.shape_cast %61 : vector<2x8xf32> to vector<2x8x1xf32>
    %63 = vector.broadcast %62 : vector<2x8x1xf32> to vector<2x8x8xf32>
    %64 = arith.divf %60, %63 : vector<2x8x8xf32>
    %cst_22 = arith.constant dense<0.000000e+00> : vector<2x8x8xf32>
    %65 = tpu.matmul %64, %52, %cst_22 {dimension_numbers = #tpu.dot_dimension_numbers<[2], [1], [1], [2], [0, 0, 0, 1, 1, 2], [0], [0]>} : vector<2x8x8xf32>, vector<2x8x8xf32>, vector<2x8x8xf32> -> vector<2x8x8xf32>
    %66 = vector.extract_strided_slice %27 {offsets = [0, 16], sizes = [16, 8], strides = [1, 1]} : vector<16x96xf32> to vector<16x8xf32>
    %67 = vector.shape_cast %66 : vector<16x8xf32> to vector<2x8x8xf32>
    %68 = vector.extract_strided_slice %27 {offsets = [0, 48], sizes = [16, 8], strides = [1, 1]} : vector<16x96xf32> to vector<16x8xf32>
    %69 = vector.shape_cast %68 : vector<16x8xf32> to vector<2x8x8xf32>
    %70 = vector.extract_strided_slice %27 {offsets = [0, 80], sizes = [16, 8], strides = [1, 1]} : vector<16x96xf32> to vector<16x8xf32>
    %71 = vector.shape_cast %70 : vector<16x8xf32> to vector<2x8x8xf32>
    %cst_23 = arith.constant dense<0.000000e+00> : vector<2x8x8xf32>
    %72 = tpu.matmul %67, %69, %cst_23 {dimension_numbers = #tpu.dot_dimension_numbers<[2], [2], [1], [1], [0, 0, 0, 1, 1, 1], [0], [0]>} : vector<2x8x8xf32>, vector<2x8x8xf32>, vector<2x8x8xf32> -> vector<2x8x8xf32>
    %cst_24 = arith.constant 0.353553385 : f32
    %73 = vector.broadcast %cst_24 : f32 to vector<2x8x8xf32>
    %74 = arith.mulf %72, %73 : vector<2x8x8xf32>
    %cst_25 = arith.constant dense<0xFF800000> : vector<2x8xf32>
    %75 = vector.multi_reduction <maximumf>, %74, %cst_25 [2] : vector<2x8x8xf32> to vector<2x8xf32>
    %76 = vector.shape_cast %75 : vector<2x8xf32> to vector<2x8x1xf32>
    %77 = vector.broadcast %76 : vector<2x8x1xf32> to vector<2x8x8xf32>
    %78 = arith.subf %74, %77 : vector<2x8x8xf32>
    %79 = math.exp %78 : vector<2x8x8xf32>
    %cst_26 = arith.constant dense<0.000000e+00> : vector<2x8xf32>
    %80 = vector.multi_reduction <add>, %79, %cst_26 [2] : vector<2x8x8xf32> to vector<2x8xf32>
    %81 = vector.shape_cast %80 : vector<2x8xf32> to vector<2x8x1xf32>
    %82 = vector.broadcast %81 : vector<2x8x1xf32> to vector<2x8x8xf32>
    %83 = arith.divf %79, %82 : vector<2x8x8xf32>
    %cst_27 = arith.constant dense<0.000000e+00> : vector<2x8x8xf32>
    %84 = tpu.matmul %83, %71, %cst_27 {dimension_numbers = #tpu.dot_dimension_numbers<[2], [1], [1], [2], [0, 0, 0, 1, 1, 2], [0], [0]>} : vector<2x8x8xf32>, vector<2x8x8xf32>, vector<2x8x8xf32> -> vector<2x8x8xf32>
    %85 = vector.extract_strided_slice %27 {offsets = [0, 24], sizes = [16, 8], strides = [1, 1]} : vector<16x96xf32> to vector<16x8xf32>
    %86 = vector.shape_cast %85 : vector<16x8xf32> to vector<2x8x8xf32>
    %87 = vector.extract_strided_slice %27 {offsets = [0, 56], sizes = [16, 8], strides = [1, 1]} : vector<16x96xf32> to vector<16x8xf32>
    %88 = vector.shape_cast %87 : vector<16x8xf32> to vector<2x8x8xf32>
    %89 = vector.extract_strided_slice %27 {offsets = [0, 88], sizes = [16, 8], strides = [1, 1]} : vector<16x96xf32> to vector<16x8xf32>
    %90 = vector.shape_cast %89 : vector<16x8xf32> to vector<2x8x8xf32>
    %cst_28 = arith.constant dense<0.000000e+00> : vector<2x8x8xf32>
    %91 = tpu.matmul %86, %88, %cst_28 {dimension_numbers = #tpu.dot_dimension_numbers<[2], [2], [1], [1], [0, 0, 0, 1, 1, 1], [0], [0]>} : vector<2x8x8xf32>, vector<2x8x8xf32>, vector<2x8x8xf32> -> vector<2x8x8xf32>
    %cst_29 = arith.constant 0.353553385 : f32
    %92 = vector.broadcast %cst_29 : f32 to vector<2x8x8xf32>
    %93 = arith.mulf %91, %92 : vector<2x8x8xf32>
    %cst_30 = arith.constant dense<0xFF800000> : vector<2x8xf32>
    %94 = vector.multi_reduction <maximumf>, %93, %cst_30 [2] : vector<2x8x8xf32> to vector<2x8xf32>
    %95 = vector.shape_cast %94 : vector<2x8xf32> to vector<2x8x1xf32>
    %96 = vector.broadcast %95 : vector<2x8x1xf32> to vector<2x8x8xf32>
    %97 = arith.subf %93, %96 : vector<2x8x8xf32>
    %98 = math.exp %97 : vector<2x8x8xf32>
    %cst_31 = arith.constant dense<0.000000e+00> : vector<2x8xf32>
    %99 = vector.multi_reduction <add>, %98, %cst_31 [2] : vector<2x8x8xf32> to vector<2x8xf32>
    %100 = vector.shape_cast %99 : vector<2x8xf32> to vector<2x8x1xf32>
    %101 = vector.broadcast %100 : vector<2x8x1xf32> to vector<2x8x8xf32>
    %102 = arith.divf %98, %101 : vector<2x8x8xf32>
    %cst_32 = arith.constant dense<0.000000e+00> : vector<2x8x8xf32>
    %103 = tpu.matmul %102, %90, %cst_32 {dimension_numbers = #tpu.dot_dimension_numbers<[2], [1], [1], [2], [0, 0, 0, 1, 1, 2], [0], [0]>} : vector<2x8x8xf32>, vector<2x8x8xf32>, vector<2x8x8xf32> -> vector<2x8x8xf32>
    %104 = tpu.concatenate %45, %64, %83, %102 in 2 : vector<2x8x8xf32>, vector<2x8x8xf32>, vector<2x8x8xf32>, vector<2x8x8xf32> -> vector<2x8x32xf32>
    %c0_33 = arith.constant 0 : index
    %c0_34 = arith.constant 0 : index
    %c0_35 = arith.constant 0 : index
    %105 = vector.load %arg7[%c0_33, %c0_34, %c0_35] : memref<2x8x32xf32, #tpu.memory_space<vmem>>, vector<2x8x32xf32>
    tpu.vector_store %arg7[%c0_33, %c0_34, %c0_35], %104 {strides = array<i32>} : memref<2x8x32xf32, #tpu.memory_space<vmem>>, vector<2x8x32xf32>,
    %106 = tpu.concatenate %46, %65, %84, %103 in 2 : vector<2x8x8xf32>, vector<2x8x8xf32>, vector<2x8x8xf32>, vector<2x8x8xf32> -> vector<2x8x32xf32>
    %107 = vector.shape_cast %106 : vector<2x8x32xf32> to vector<16x32xf32>
    %c0_36 = arith.constant 0 : index
    %c0_37 = arith.constant 0 : index
    %108 = vector.load %arg5[%c0_36, %c0_37] : memref<32x32xf32, #tpu.memory_space<vmem>>, vector<32x32xf32>
    %cst_38 = arith.constant dense<0.000000e+00> : vector<16x32xf32>
    %109 = tpu.matmul %107, %108, %cst_38 {dimension_numbers = #tpu.dot_dimension_numbers<[1], [0], [0], [1], [0, 0, 1, 1], [], []>} : vector<16x32xf32>, vector<32x32xf32>, vector<16x32xf32> -> vector<16x32xf32>
    %110 = vector.shape_cast %109 : vector<16x32xf32> to vector<2x8x32xf32>
    %c0_39 = arith.constant 0 : index
    %c0_40 = arith.constant 0 : index
    %c0_41 = arith.constant 0 : index
    %111 = vector.load %arg6[%c0_39, %c0_40, %c0_41] : memref<2x8x32xf32, #tpu.memory_space<vmem>>, vector<2x8x32xf32>
    tpu.vector_store %arg6[%c0_39, %c0_40, %c0_41], %110 {strides = array<i32>} : memref<2x8x32xf32, #tpu.memory_space<vmem>>, vector<2x8x32xf32>,
    return
  }
  func.func @transform_0(%arg0: i32) -> (i32, i32, i32) {
    %c0_i32 = arith.constant 0 : i32
    %c0_i32_0 = arith.constant 0 : i32
    %c0_i32_1 = arith.constant 0 : i32
    return %arg0, %c0_i32, %c0_i32_0 : i32, i32, i32
  }
  func.func @transform_1(%arg0: i32) -> (i32, i32) {
    %c0_i32 = arith.constant 0 : i32
    %c0_i32_0 = arith.constant 0 : i32
    %c0_i32_1 = arith.constant 0 : i32
    return %c0_i32, %c0_i32_0 : i32, i32
  }
  func.func @transform_2(%arg0: i32) -> (i32, i32) {
    %c0_i32 = arith.constant 0 : i32
    %c0_i32_0 = arith.constant 0 : i32
    %c0_i32_1 = arith.constant 0 : i32
    return %c0_i32, %c0_i32_0 : i32, i32
  }
  func.func @transform_3(%arg0: i32) -> (i32, i32) {
    %c0_i32 = arith.constant 0 : i32
    %c0_i32_0 = arith.constant 0 : i32
    %c0_i32_1 = arith.constant 0 : i32
    return %c0_i32, %c0_i32_0 : i32, i32
  }
  func.func @transform_4(%arg0: i32) -> (i32, i32) {
    %c0_i32 = arith.constant 0 : i32
    %c0_i32_0 = arith.constant 0 : i32
    %c0_i32_1 = arith.constant 0 : i32
    return %c0_i32, %c0_i32_0 : i32, i32
  }
  func.func @transform_5(%arg0: i32) -> (i32, i32, i32) {
    %c0_i32 = arith.constant 0 : i32
    %c0_i32_0 = arith.constant 0 : i32
    %c0_i32_1 = arith.constant 0 : i32
    return %arg0, %c0_i32, %c0_i32_0 : i32, i32, i32
  }
  func.func @transform_6(%arg0: i32) -> (i32, i32, i32) {
    %c0_i32 = arith.constant 0 : i32
    %c0_i32_0 = arith.constant 0 : i32
    %c0_i32_1 = arith.constant 0 : i32
    return %arg0, %c0_i32, %c0_i32_0 : i32, i32, i32
  }
}

</mosaic_0001>

<bundles_post_ra>
// kernel: tpu_custom_call.1
= control target key start
LH: loop header
LB: loop body
LE: loop exit
PB: predicated region body
PF: predicated region fallthrough
CT: control target
= control target key end

     0   :  { %12 = vsyncpa [#allocation3], 0  ;;  %s2401_s0 = inlined_call_operand.hbm [shape: f32[2,8,32], index: 0, kind: input, shape index: {}]   ;;  %s2402_s1 = inlined_call_operand.vmem [shape: f32[1,32], index: 1, kind: input, shape index: {}]   ;;  %s2403_s2 = inlined_call_operand.vmem [shape: f32[1,32], index: 2, kind: input, shape index: {}]   ;;  %s2404_s3 = inlined_call_operand.hbm [shape: f32[32,96], index: 3, kind: input, shape index: {}]   ;;  %s2405_s4 = inlined_call_operand.hbm [shape: f32[32,32], index: 4, kind: input, shape index: {}]   ;;  %s2406_s5 = inlined_call_operand.hbm [shape: f32[2,8,32], index: 5, kind: output, shape index: {0}]   ;;  %s2407_s6 = inlined_call_operand.hbm [shape: f32[2,8,32], index: 6, kind: output, shape index: {1}]  }
   0x1   :  { %13 = vsyncpa [#allocation6], 0 }
   0x2   :  { %14 = vsyncpa [#allocation4], 0 }
   0x3   :  { %15 = vsyncpa [#allocation10], 0  ;;  %s2072_s21 = smov [#allocation5]   ;;  %s2073_s23 = smov [#allocation2]  }
   0x4   :  { %s37_s22 = sshll.u32 %s2072_s21, 4  ;;  %s21_s24 = sshll.u32 %s2073_s23, 4  ;;  %s38_s22 = int_to_ptr.vmem [resolvable:$true] %s37_s22  ;;  %s2129_s24 = int_to_ptr.vmem [resolvable:$true] %s21_s24 }
   0x5   :  { %s1954_s27 = scalar_lea.hbm %s2404_s3, 512 }
   0x6   :  { %p1955_p0 = scmp.ne.s32.totalorder %s2404_s3, %s1954_s27  ;;  %p1958_p1 = scmp.lt.u32.totalorder %s1954_s27, %s2404_s3 }
   0x8   :  { %p1960_p2 = pnand %p1958_p1, %p1955_p0 }
   0xa   :  { %1963 = shalt.err (!%p1960_p2)
}
   0xb   :  { %s1964_s8 = scalar_lea.vmem %s38_s22, 512  ;;  %p1969_p4 = scmp.lt.s32.totalorder %s38_s22, %s38_s22 }
   0xc   :  { %p1965_p3 = scmp.ne.s32.totalorder %s38_s22, %s1964_s8  ;;  %p1970_p5 = scmp.lt.s32.totalorder %s1964_s8, %s1964_s8 }
   0xe   :  { %p1971_p6 = por %p1970_p5, %p1969_p4 }
  0x10   :  { %p1972_p7 = pnand %p1971_p6, %p1965_p3 }
  0x12   :  { %1975 = shalt.err (!%p1972_p7)
}
  0x13   :  { %s2074_s9 = smov 128   ;;  %s2075_s10 = smov 8  }
  0x14   :  { %43 = dma.hbm_to_vmem [thread:$0]  %s2404_s3, 512, %s38_s22, [#allocation6], %s2074_s9, %s2074_s9, %s2075_s10  }
  0x15   :  { %s1976_s15 = scalar_lea.hbm %s2401_s0, 256 }
  0x16   :  { %p1977_p8 = scmp.ne.s32.totalorder %s2401_s0, %s1976_s15  ;;  %p1980_p9 = scmp.lt.u32.totalorder %s1976_s15, %s2401_s0 }
  0x18   :  { %p1982_p10 = pnand %p1980_p9, %p1977_p8 }
  0x1a   :  { %1985 = shalt.err (!%p1982_p10)
}
  0x1b   :  { %s1986_s20 = scalar_lea.vmem %s2129_s24, 256  ;;  %p1991_p12 = scmp.lt.s32.totalorder %s2129_s24, %s2129_s24 }
  0x1c   :  { %p1987_p11 = scmp.ne.s32.totalorder %s2129_s24, %s1986_s20  ;;  %p1992_p13 = scmp.lt.s32.totalorder %s1986_s20, %s1986_s20 }
  0x1e   :  { %p1993_p0 = por %p1992_p13, %p1991_p12 }
  0x20   :  { %p1994_p1 = pnand %p1993_p0, %p1987_p11 }
  0x22   :  { %1997 = shalt.err (!%p1994_p1)
}
  0x23   :  { %27 = dma.hbm_to_vmem [thread:$0]  %s2401_s0, 256, %s2129_s24, [#allocation3], %s2074_s9, %s2074_s9, %s2075_s10  }
  0x24   :  { %s2076_s22 = smov [#allocation7]   ;;  %s1998_s27 = scalar_lea.hbm %s2405_s4, 512 }
  0x25   :  { %s49_s23 = sshll.u32 %s2076_s22, 4  ;;  %p1999_p2 = scmp.ne.s32.totalorder %s2405_s4, %s1998_s27  ;;  %s50_s23 = int_to_ptr.vmem [resolvable:$true] %s49_s23 }
  0x26   :  { %p2002_p3 = scmp.lt.u32.totalorder %s1998_s27, %s2405_s4 }
  0x28   :  { %p2004_p4 = pnand %p2002_p3, %p1999_p2 }
  0x2a   :  { %2007 = shalt.err (!%p2004_p4)
}
  0x2b   :  { %s2008_s8 = scalar_lea.vmem %s50_s23, 512  ;;  %p2013_p6 = scmp.lt.s32.totalorder %s50_s23, %s50_s23 }
  0x2c   :  { %p2009_p5 = scmp.ne.s32.totalorder %s50_s23, %s2008_s8  ;;  %p2014_p7 = scmp.lt.s32.totalorder %s2008_s8, %s2008_s8 }
  0x2e   :  { %p2015_p8 = por %p2014_p7, %p2013_p6 }
  0x30   :  { %p2016_p9 = pnand %p2015_p8, %p2009_p5 }
  0x32   :  { %2019 = shalt.err (!%p2016_p9)
}
  0x33   :  { %55 = dma.hbm_to_vmem [thread:$0]  %s2405_s4, 512, %s50_s23, [#allocation6], %s2074_s9, %s2074_s9, %s2075_s10  }
  0x34   :  { %2064 = dma.done.wait [#allocation3], 256  }
  0x35   :  { %2065 = vsyncadd [#allocation3], 4294967040 }
  0x36   :  { %2066 = dma.done.wait [#allocation6], 1024  }
  0x37   :  { %2067 = vsyncadd [#allocation6], 4294966272  ;;  %vm67_vm0 = vcmask 261120   ;;  %v65_v0 = vld [vmem:[#allocation2] sm:$0xff]  ;;  %v66_v1 = vld [vmem:[#allocation2 + $0x8] sm:$0xff]  ;;  %v2077_v36 = vmov 0.0  }
  0x38   :  { %v68_v2 = vsel %vm67_vm0, %v65_v0, 0.0  ;;  %v71_v3 = vsel %vm67_vm0, %v66_v1, 0.0  ;;  %v113_v14 = vld [vmem:[#allocation5] sm:$0xff]  ;;  %v114_v15 = vld [vmem:[#allocation5 + $0x8] sm:$0xff]  ;;  %v115_v16 = vld [vmem:[#allocation5 + $0x10] sm:$0xff]  ;;  %1789 = vmatprep.subr.mxu1 %v2077_v36  ;;  %vm2078_vm1 = vmmov 0  }
  0x39   :  { %69 = vadd.xlane.f32.xlu0 %v68_v2  ;;  %v1880_v17 = vpack.c.bf16 %v114_v15, %v113_v14  ;;  %v116_v18 = vld [vmem:[#allocation5 + $0x18] sm:$0xff]  ;;  %v1704_v27 = vld [vmem:[%s2402_s1] ss:$0 sm:$0xff]  ;;  %1791 = vmatprep.mubr.msk.f32.mxu1 %vm2078_vm1, %v2077_v36  ;;  %s2079_s1 = smov 96   ;;  %vm201_vm2 = vcmask 64512   ;;  %s2081_s14 = smov 88  }
  0x3a   :  { %v1884_v19 = vpack.c.bf16 %v116_v18, %v115_v16  ;;  %v1705_v29 = vld [vmem:[%s2403_s2] ss:$0 sm:$0xff]  ;;  %s2080_s2 = smov 64   ;;  %s2082_s15 = smov 120   ;;  %vm1548_vm3 = vcmask 195584   ;;  %vm1545_vm4 = vcmask 130048  }
  0x3b   :  { %1881 = vmatprep.subr.bf16.mxu0 %v1880_v17  ;;  %s2083_s16 = smov 56   ;;  %s2084_s17 = smov 80  }
  0x3c   :  { %1883 = vmatpush3.bf16.msra.mxu0 %v1880_v17  ;;  %s2085_s18 = smov 112   ;;  %s2086_s19 = smov 48  }
  0x3d   :  { %72 = vadd.xlane.f32.xlu0 %v71_v3  ;;  %1885 = vmatprep.subr.bf16.mxu0 %v1884_v19  ;;  %s2087_s20 = smov 72   ;;  %s2088_s3 = smov 104  }
  0x3e   :  { %s2089_s21 = smov 40   ;;  %s2090_s22 = smov 16  }
  0x3f   :  { %s2091_s23 = smov 24   ;;  %s2092_s25 = smov [#allocation9]  }
  0x40   :  { %1887 = vmatpush3.bf16.msra.mxu0 %v1884_v19  ;;  %s1687_s26 = sshll.u32 %s2092_s25, 4  ;;  %s1688_s26 = int_to_ptr.vmem [resolvable:$true] %s1687_s26 }
  0x41   :  { %1809 = vmatprep.subr.mxu0 %v2077_v36  ;;  %s2020_s27 = scalar_lea.vmem %s1688_s26, 256  ;;  %p2025_p11 = scmp.lt.s32.totalorder %s1688_s26, %s1688_s26 }
  0x42   :  { %p2021_p10 = scmp.ne.s32.totalorder %s1688_s26, %s2020_s27  ;;  %p2026_p12 = scmp.lt.s32.totalorder %s2020_s27, %s2020_s27 }
  0x44   :  { %p2027_p13 = por %p2026_p12, %p2025_p11 }
  0x46   :  { %p2028_p0 = pnand %p2027_p13, %p2021_p10 }
  0xc6   :  { %v70_v4 = vpop.xlane.xlu0 %69 }
  0xc7   :  { %v75_v5 = vmul.f32 0.03125, %v70_v4 }
  0xc9   :  { %v77_v6 = vsub.f32 %v65_v0, %v75_v5 }
  0xca   :  { %v73_v7 = vpop.xlane.xlu0 %72 }
  0xcb   :  { %v76_v8 = vmul.f32 0.03125, %v73_v7  ;;  %v79_v9 = vmul.f32 %v77_v6, %v77_v6 }
  0xcd   :  { %v78_v10 = vsub.f32 %v66_v1, %v76_v8  ;;  %v81_v11 = vsel %vm67_vm0, %v79_v9, 0.0 }
  0xce   :  { %82 = vadd.xlane.f32.xlu1 %v81_v11 }
  0xcf   :  { %v80_v12 = vmul.f32 %v78_v10, %v78_v10 }
  0xd1   :  { %v84_v13 = vsel %vm67_vm0, %v80_v12, 0.0 }
  0xd2   :  { %85 = vadd.xlane.f32.xlu1 %v84_v13 }
 0x15b   :  { %v83_v20 = vpop.xlane.xlu1 %82 }
 0x15c   :  { %v87_v21 = vmul.f32 0.03125, %v83_v20 }
 0x15e   :  { %v89_v22 = vadd.f32 1e-05, %v87_v21 }
 0x15f   :  { %v86_v23 = vpop.xlane.xlu1 %85 }
 0x160   :  { %1918 = vrsqrt.f32 %v89_v22  ;;  %v88_v24 = vmul.f32 0.03125, %v86_v23 }
 0x162   :  { %v90_v25 = vadd.f32 1e-05, %v88_v24 }
 0x164   :  { %1920 = vrsqrt.f32 %v90_v25 }
 0x16a   :  { %v1919_v26 = vpop.eup %1918 }
 0x16b   :  { %v93_v28 = vmul.f32 %v1919_v26, %v77_v6 }
 0x16d   :  { %v102_v30 = vmul.f32 %v1704_v27, %v93_v28 }
 0x16e   :  { %v1921_v31 = vpop.eup %1920 }
 0x16f   :  { %v94_v32 = vmul.f32 %v1921_v31, %v78_v10  ;;  %v111_v33 = vadd.f32 %v1705_v29, %v102_v30 }
 0x171   :  { %v103_v34 = vmul.f32 %v1704_v27, %v94_v32  ;;  %1786 = vmatprep.mubr.msk.f32.mxu0 %vm67_vm0, %v111_v33 }
 0x173   :  { %v112_v35 = vadd.f32 %v1705_v29, %v103_v34 }
 0x175   :  { %1787 = vmatmul.mubr.msk.f32.vlgmr.msra.gmra.mrb[0].mxu0 %vm67_vm0, %v112_v35 }
 0x176   :  { %1811 = vmatprep.mubr.msk.f32.mxu0 %vm2078_vm1, %v2077_v36 }
 0x248   :  { %v2199_v37 = vpop.f32.mrb[0].mxu0 }
 0x249   :  { %277 = vrot.lane.b32.xlu1 %v2199_v37, %s2079_s1  ;;  %v2202_v38 = vpop.f32.mrb[1].mxu0 }
 0x24a   :  { %199 = vrot.lane.b32.xlu0 %v2202_v38, %s2079_s1 }
 0x2bb   :  { %v278_v40 = vpop.permute.xlu1 %277 }
 0x2bc   :  { %v200_v39 = vpop.permute.xlu0 %199 }
 0x2bd   :  { %1790 = vmatpush3.xpose.msk.msra.mxu1 %vm201_vm2, %v200_v39 }
 0x2be   :  { %1794 = vmatprep.subr.mxu1 %v2077_v36 }
 0x2c0   :  { %1792 = vmatmul.mubr.msk.f32.vlgmr.msra.gmra.mrb[0].mxu1 %vm201_vm2, %v2202_v38 }
 0x2c1   :  { %1795 = vmatpush3.xpose.msk.msra.mxu1 %vm201_vm2, %v278_v40  ;;  %1796 = vmatprep.mubr.msk.f32.mxu1 %vm2078_vm1, %v2077_v36 }
 0x2c2   :  { %1799 = vmatprep.subr.mxu1 %v2077_v36 }
 0x2c4   :  { %1797 = vmatmul.mubr.msk.f32.vlgmr.msra.gmra.mrb[2].mxu1 %vm201_vm2, %v2199_v37 }
 0x2c5   :  { %1801 = vmatprep.mubr.msk.f32.mxu1 %vm2078_vm1, %v2077_v36 }
 0x393   :  { %v272_v41 = vpop.f32.mrb[0].mxu1 }
 0x394   :  { %v353_v42 = vmul.f32 0.35355338, %v272_v41  ;;  %v1793_v43 = vpop.f32.mrb[1].mxu1 }
 0x396   :  { %v355_v44 = vsel %vm201_vm2, %v353_v42, -inf }
 0x397   :  { %356 = vmax.xlane.f32.xlu1 %v355_v44  ;;  %v349_v45 = vpop.f32.mrb[2].mxu1 }
 0x398   :  { %v354_v46 = vmul.f32 0.35355338, %v349_v45  ;;  %v1798_v47 = vpop.f32.mrb[3].mxu1 }
 0x39a   :  { %v358_v48 = vsel %vm201_vm2, %v354_v46, -inf }
 0x39b   :  { %359 = vmax.xlane.f32.xlu0 %v358_v48 }
 0x3a8   :  { %453 = vrot.lane.b32.xlu1 %v2199_v37, %s2080_s2 }
 0x3ac   :  { %531 = vrot.lane.b32.xlu1 %v2202_v38, %s2081_s14 }
 0x3b0   :  { %609 = vrot.lane.b32.xlu1 %v2199_v37, %s2081_s14 }
 0x424   :  { %v357_v49 = vpop.xlane.xlu1 %356 }
 0x425   :  { %v361_v50 = vsub.f32 %v353_v42, %v357_v49 }
 0x427   :  { %v363_v51 = vmul.f32 1.442695, %v361_v50 }
 0x428   :  { %v454_v52 = vpop.permute.xlu1 %453  ;;  %v360_v53 = vpop.xlane.xlu0 %359 }
 0x429   :  { %1922 = vpow2.f32 %v363_v51  ;;  %v362_v54 = vsub.f32 %v354_v46, %v360_v53 }
 0x42b   :  { %v365_v55 = vmul.f32 1.442695, %v362_v54 }
 0x42c   :  { %v532_v56 = vpop.permute.xlu1 %531 }
 0x42d   :  { %1924 = vpow2.f32 %v365_v55  ;;  %1810 = vmatpush3.xpose.msk.msra.mxu0 %vm201_vm2, %v532_v56 }
 0x42e   :  { %1819 = vmatprep.subr.mxu0 %v2077_v36 }
 0x430   :  { %v610_v61 = vpop.permute.xlu1 %609 }
 0x433   :  { %v1923_v57 = vpop.eup %1922 }
 0x434   :  { %v367_v58 = vsel %vm201_vm2, %v1923_v57, 0.0 }
 0x435   :  { %368 = vadd.xlane.f32.xlu0 %v367_v58 }
 0x437   :  { %v1925_v59 = vpop.eup %1924 }
 0x438   :  { %v370_v60 = vsel %vm201_vm2, %v1925_v59, 0.0 }
 0x439   :  { %371 = vadd.xlane.f32.xlu1 %v370_v60 }
 0x44a   :  { %607 = vrot.lane.b32.xlu1 %v2199_v37, %s2082_s15 }
 0x44b   :  { %377 = vrot.lane.b32.xlu0 %v2202_v38, %s2080_s2 }
 0x44f   :  { %529 = vrot.lane.b32.xlu0 %v2202_v38, %s2082_s15 }
 0x4c2   :  { %v369_v62 = vpop.xlane.xlu0 %368 }
 0x4c3   :  { %1926 = vrcp.f32 %v369_v62 }
 0x4c6   :  { %v372_v63 = vpop.xlane.xlu1 %371  ;;  %v378_v0 = vpop.permute.xlu0 %377 }
 0x4c7   :  { %1928 = vrcp.f32 %v372_v63  ;;  %1800 = vmatpush3.msra.mxu1 %v378_v0 }
 0x4c8   :  { %1804 = vmatprep.subr.mxu1 %v2077_v36 }
 0x4ca   :  { %v530_v1 = vpop.permute.xlu0 %529  ;;  %v608_v6 = vpop.permute.xlu1 %607 }
 0x4cb   :  { %1812 = vmatmul.mubr.msk.f32.vlgmr.msra.gmra.mrb[2].mxu0 %vm201_vm2, %v530_v1 }
 0x4cc   :  { %1821 = vmatprep.mubr.msk.f32.mxu0 %vm2078_vm1, %v2077_v36 }
 0x4cd   :  { %v1927_v2 = vpop.eup %1926 }
 0x4ce   :  { %v2233_v3 = vmul.f32 %v1927_v2, %v1923_v57 }
 0x4d0   :  { %1802 = vmatmul.mubr.msk.f32.vlgmr.msra.gmra.mrb[4].mxu1 %vm201_vm2, %v2233_v3 }
 0x4d1   :  { %v1929_v4 = vpop.eup %1928  ;;  %1805 = vmatpush3.msra.mxu1 %v454_v52  ;;  %1806 = vmatprep.mubr.msk.f32.mxu1 %vm2078_vm1, %v2077_v36 }
 0x4d2   :  { %v2239_v5 = vmul.f32 %v1929_v4, %v1925_v59  ;;  %1814 = vmatprep.subr.mxu1 %v2077_v36 }
 0x4d4   :  { %1807 = vmatmul.mubr.msk.f32.vlgmr.msra.gmra.mrb[6].mxu1 %vm201_vm2, %v2239_v5 }
 0x4d5   :  { %1816 = vmatprep.mubr.msk.f32.mxu1 %vm2078_vm1, %v2077_v36 }
 0x4d8   :  { %1815 = vmatpush3.xpose.msk.msra.mxu1 %vm201_vm2, %v610_v61 }
 0x4d9   :  { %1824 = vmatprep.subr.mxu1 %v2077_v36 }
 0x4db   :  { %1817 = vmatmul.mubr.msk.f32.vlgmr.msra.gmra.mrb[8].mxu1 %vm201_vm2, %v608_v6 }
 0x4dc   :  { %1826 = vmatprep.mubr.msk.f32.mxu1 %vm2078_vm1, %v2077_v36 }
 0x59e   :  { %v603_v7 = vpop.f32.mrb[2].mxu0 }
 0x59f   :  { %v685_v8 = vmul.f32 0.35355338, %v603_v7  ;;  %v1813_v9 = vpop.f32.mrb[3].mxu0 }
 0x5a1   :  { %v687_v10 = vsel %vm201_vm2, %v685_v8, -inf }
 0x5a2   :  { %688 = vmax.xlane.f32.xlu0 %v687_v10 }
 0x5a3   :  { %v2252_v11 = vpop.f32.mrb[4].mxu1 }
 0x5a4   :  { %v1803_v12 = vpop.f32.mrb[5].mxu1 }
 0x5a7   :  { %v2254_v13 = vpop.f32.mrb[6].mxu1 }
 0x5a8   :  { %v1808_v14 = vpop.f32.mrb[7].mxu1 }
 0x5ae   :  { %v681_v15 = vpop.f32.mrb[8].mxu1 }
 0x5af   :  { %v686_v16 = vmul.f32 0.35355338, %v681_v15  ;;  %v1818_v17 = vpop.f32.mrb[9].mxu1 }
 0x5b1   :  { %v690_v18 = vsel %vm201_vm2, %v686_v16, -inf }
 0x5b2   :  { %691 = vmax.xlane.f32.xlu1 %v690_v18 }
 0x5c3   :  { %785 = vrot.lane.b32.xlu1 %v2199_v37, %s2083_s16 }
 0x5c7   :  { %863 = vrot.lane.b32.xlu1 %v2202_v38, %s2084_s17 }
 0x5cb   :  { %941 = vrot.lane.b32.xlu1 %v2199_v37, %s2084_s17 }
 0x5cf   :  { %939 = vrot.lane.b32.xlu1 %v2199_v37, %s2085_s18 }
 0x62f   :  { %v689_v19 = vpop.xlane.xlu0 %688 }
 0x630   :  { %v693_v20 = vsub.f32 %v685_v8, %v689_v19 }
 0x632   :  { %v695_v21 = vmul.f32 1.442695, %v693_v20 }
 0x634   :  { %1930 = vpow2.f32 %v695_v21 }
 0x63e   :  { %v1931_v22 = vpop.eup %1930 }
 0x63f   :  { %v692_v23 = vpop.xlane.xlu1 %691  ;;  %v699_v24 = vsel %vm201_vm2, %v1931_v22, 0.0 }
 0x640   :  { %700 = vadd.xlane.f32.xlu0 %v699_v24  ;;  %v694_v26 = vsub.f32 %v686_v16, %v692_v23 }
 0x642   :  { %v697_v27 = vmul.f32 1.442695, %v694_v26 }
 0x643   :  { %v786_v25 = vpop.permute.xlu1 %785 }
 0x644   :  { %1825 = vmatpush3.msra.mxu1 %v786_v25  ;;  %1932 = vpow2.f32 %v697_v27 }
 0x645   :  { %1834 = vmatprep.subr.mxu1 %v2077_v36 }
 0x647   :  { %v864_v34 = vpop.permute.xlu1 %863 }
 0x64b   :  { %v942_v41 = vpop.permute.xlu1 %941 }
 0x64e   :  { %v1933_v28 = vpop.eup %1932 }
 0x64f   :  { %v702_v29 = vsel %vm201_vm2, %v1933_v28, 0.0  ;;  %v940_v43 = vpop.permute.xlu1 %939 }
 0x656   :  { %709 = vrot.lane.b32.xlu0 %v2202_v38, %s2083_s16 }
 0x675   :  { %703 = vadd.xlane.f32.xlu0 %v702_v29 }
 0x68b   :  { %861 = vrot.lane.b32.xlu0 %v2202_v38, %s2085_s18 }
 0x6cd   :  { %v701_v30 = vpop.xlane.xlu0 %700 }
 0x6ce   :  { %1934 = vrcp.f32 %v701_v30 }
 0x6d1   :  { %v710_v31 = vpop.permute.xlu0 %709 }
 0x6d2   :  { %1820 = vmatpush3.msra.mxu0 %v710_v31 }
 0x6d3   :  { %1829 = vmatprep.subr.mxu0 %v2077_v36 }
 0x6d8   :  { %v1935_v32 = vpop.eup %1934 }
 0x6d9   :  { %v2267_v33 = vmul.f32 %v1935_v32, %v1931_v22 }
 0x6db   :  { %1822 = vmatmul.mubr.msk.f32.vlgmr.msra.gmra.mrb[4].mxu0 %vm201_vm2, %v2267_v33 }
 0x6dc   :  { %1830 = vmatpush3.xpose.msk.msra.mxu0 %vm201_vm2, %v864_v34  ;;  %1831 = vmatprep.mubr.msk.f32.mxu0 %vm2078_vm1, %v2077_v36 }
 0x6dd   :  { %1839 = vmatprep.subr.mxu0 %v2077_v36 }
 0x702   :  { %v704_v35 = vpop.xlane.xlu0 %703 }
 0x703   :  { %1936 = vrcp.f32 %v704_v35 }
 0x706   :  { %v862_v39 = vpop.permute.xlu0 %861 }
 0x707   :  { %1832 = vmatmul.mubr.msk.f32.vlgmr.msra.gmra.mrb[6].mxu0 %vm201_vm2, %v862_v39 }
 0x708   :  { %1841 = vmatprep.mubr.msk.f32.mxu0 %vm2078_vm1, %v2077_v36 }
 0x70d   :  { %v1937_v40 = vpop.eup %1936 }
 0x70e   :  { %v2278_v42 = vmul.f32 %v1937_v40, %v1933_v28 }
 0x710   :  { %1827 = vmatmul.mubr.msk.f32.vlgmr.msra.gmra.mrb[10].mxu1 %vm201_vm2, %v2278_v42 }
 0x711   :  { %1835 = vmatpush3.xpose.msk.msra.mxu1 %vm201_vm2, %v942_v41  ;;  %1836 = vmatprep.mubr.msk.f32.mxu1 %vm2078_vm1, %v2077_v36 }
 0x712   :  { %1844 = vmatprep.subr.mxu1 %v2077_v36 }
 0x714   :  { %1837 = vmatmul.mubr.msk.f32.vlgmr.msra.gmra.mrb[12].mxu1 %vm201_vm2, %v940_v43 }
 0x715   :  { %1846 = vmatprep.mubr.msk.f32.mxu1 %vm2078_vm1, %v2077_v36 }
 0x7ae   :  { %v2289_v44 = vpop.f32.mrb[4].mxu0 }
 0x7af   :  { %v1823_v45 = vpop.f32.mrb[5].mxu0 }
 0x7da   :  { %v935_v46 = vpop.f32.mrb[6].mxu0 }
 0x7db   :  { %v1017_v47 = vmul.f32 0.35355338, %v935_v46  ;;  %v1833_v48 = vpop.f32.mrb[7].mxu0 }
 0x7dd   :  { %v1019_v49 = vsel %vm201_vm2, %v1017_v47, -inf }
 0x7de   :  { %1020 = vmax.xlane.f32.xlu0 %v1019_v49 }
 0x7e3   :  { %v2292_v50 = vpop.f32.mrb[10].mxu1 }
 0x7e4   :  { %v1828_v51 = vpop.f32.mrb[11].mxu1 }
 0x7e5   :  { %v1583_v51 = vld [vmem:[#allocation7] sm:$0xff] }
 0x7e7   :  { %v1013_v52 = vpop.f32.mrb[12].mxu1 }
 0x7e8   :  { %v1018_v53 = vmul.f32 0.35355338, %v1013_v52  ;;  %v1838_v54 = vpop.f32.mrb[13].mxu1  ;;  %v1584_v52 = vld [vmem:[#allocation7 + $0x8] sm:$0xff] }
 0x7e9   :  { %v1586_v54 = vld [vmem:[#allocation7 + $0x18] sm:$0xff] }
 0x7ea   :  { %v1022_v55 = vsel %vm201_vm2, %v1018_v53, -inf }
 0x7eb   :  { %1023 = vmax.xlane.f32.xlu1 %v1022_v55 }
 0x7fc   :  { %1117 = vrot.lane.b32.xlu1 %v2199_v37, %s2086_s19 }
 0x800   :  { %1195 = vrot.lane.b32.xlu1 %v2202_v38, %s2087_s20 }
 0x804   :  { %1273 = vrot.lane.b32.xlu1 %v2199_v37, %s2087_s20 }
 0x808   :  { %1271 = vrot.lane.b32.xlu1 %v2199_v37, %s2088_s3 }
 0x86b   :  { %v1021_v56 = vpop.xlane.xlu0 %1020 }
 0x86c   :  { %v1025_v57 = vsub.f32 %v1017_v47, %v1021_v56 }
 0x86e   :  { %v1027_v58 = vmul.f32 1.442695, %v1025_v57 }
 0x870   :  { %1938 = vpow2.f32 %v1027_v58 }
 0x878   :  { %v1024_v59 = vpop.xlane.xlu1 %1023 }
 0x879   :  { %v1026_v63 = vsub.f32 %v1018_v53, %v1024_v59  ;;  %v1888_v53 = vpack.c.bf16 %v1584_v52, %v1583_v51 }
 0x87a   :  { %v1939_v60 = vpop.eup %1938 }
 0x87b   :  { %v1031_v61 = vsel %vm201_vm2, %v1939_v60, 0.0  ;;  %v1029_v0 = vmul.f32 1.442695, %v1026_v63 }
 0x87c   :  { %1032 = vadd.xlane.f32.xlu0 %v1031_v61  ;;  %v1118_v62 = vpop.permute.xlu1 %1117 }
 0x87d   :  { %1845 = vmatpush3.msra.mxu1 %v1118_v62  ;;  %1940 = vpow2.f32 %v1029_v0 }
 0x87e   :  { %1854 = vmatprep.subr.mxu1 %v2077_v36 }
 0x880   :  { %v1196_v9 = vpop.permute.xlu1 %1195 }
 0x884   :  { %v1274_v15 = vpop.permute.xlu1 %1273 }
 0x887   :  { %v1941_v1 = vpop.eup %1940 }
 0x888   :  { %v1034_v2 = vsel %vm201_vm2, %v1941_v1, 0.0  ;;  %v1272_v17 = vpop.permute.xlu1 %1271 }
 0x892   :  { %1041 = vrot.lane.b32.xlu0 %v2202_v38, %s2086_s19 }
 0x8b1   :  { %1035 = vadd.xlane.f32.xlu0 %v1034_v2 }
 0x8c7   :  { %1193 = vrot.lane.b32.xlu0 %v2202_v38, %s2088_s3 }
 0x909   :  { %v1033_v4 = vpop.xlane.xlu0 %1032 }
 0x90a   :  { %1942 = vrcp.f32 %v1033_v4 }
 0x90d   :  { %v1042_v6 = vpop.permute.xlu0 %1041 }
 0x90e   :  { %1840 = vmatpush3.msra.mxu0 %v1042_v6 }
 0x90f   :  { %1849 = vmatprep.subr.mxu0 %v2077_v36 }
 0x914   :  { %v1943_v7 = vpop.eup %1942 }
 0x915   :  { %v2305_v8 = vmul.f32 %v1943_v7, %v1939_v60 }
 0x917   :  { %1842 = vmatmul.mubr.msk.f32.vlgmr.msra.gmra.mrb[8].mxu0 %vm201_vm2, %v2305_v8 }
 0x918   :  { %1850 = vmatpush3.xpose.msk.msra.mxu0 %vm201_vm2, %v1196_v9  ;;  %1851 = vmatprep.mubr.msk.f32.mxu0 %vm2078_vm1, %v2077_v36 }
 0x919   :  { %1859 = vmatprep.subr.mxu0 %v2077_v36 }
 0x93e   :  { %v1036_v10 = vpop.xlane.xlu0 %1035 }
 0x93f   :  { %1944 = vrcp.f32 %v1036_v10 }
 0x942   :  { %v1194_v12 = vpop.permute.xlu0 %1193 }
 0x943   :  { %1852 = vmatmul.mubr.msk.f32.vlgmr.msra.gmra.mrb[10].mxu0 %vm201_vm2, %v1194_v12 }
 0x944   :  { %1861 = vmatprep.mubr.msk.f32.mxu0 %vm2078_vm1, %v2077_v36 }
 0x949   :  { %v1945_v14 = vpop.eup %1944 }
 0x94a   :  { %v2316_v16 = vmul.f32 %v1945_v14, %v1941_v1 }
 0x94c   :  { %1847 = vmatmul.mubr.msk.f32.vlgmr.msra.gmra.mrb[14].mxu1 %vm201_vm2, %v2316_v16 }
 0x94d   :  { %1855 = vmatpush3.xpose.msk.msra.mxu1 %vm201_vm2, %v1274_v15  ;;  %1856 = vmatprep.mubr.msk.f32.mxu1 %vm2078_vm1, %v2077_v36 }
 0x94e   :  { %1864 = vmatprep.subr.mxu1 %v2077_v36 }
 0x950   :  { %1857 = vmatmul.mubr.msk.f32.vlgmr.msra.gmra.mrb[16].mxu1 %vm201_vm2, %v1272_v17 }
 0x951   :  { %1866 = vmatprep.mubr.msk.f32.mxu1 %vm2078_vm1, %v2077_v36 }
 0x9ea   :  { %v1113_v18 = vpop.f32.mrb[8].mxu0 }
 0x9eb   :  { %v1843_v19 = vpop.f32.mrb[9].mxu0 }
 0xa16   :  { %v1267_v20 = vpop.f32.mrb[10].mxu0 }
 0xa17   :  { %v1349_v21 = vmul.f32 0.35355338, %v1267_v20  ;;  %v1853_v22 = vpop.f32.mrb[11].mxu0 }
 0xa19   :  { %v1351_v23 = vsel %vm201_vm2, %v1349_v21, -inf }
 0xa1a   :  { %1352 = vmax.xlane.f32.xlu0 %v1351_v23 }
 0xa1f   :  { %v1189_v24 = vpop.f32.mrb[14].mxu1 }
 0xa20   :  { %v1848_v25 = vpop.f32.mrb[15].mxu1 }
 0xa23   :  { %v1345_v26 = vpop.f32.mrb[16].mxu1 }
 0xa24   :  { %v1350_v27 = vmul.f32 0.35355338, %v1345_v26  ;;  %v1858_v28 = vpop.f32.mrb[17].mxu1 }
 0xa26   :  { %v1354_v29 = vsel %vm201_vm2, %v1350_v27, -inf }
 0xa27   :  { %1355 = vmax.xlane.f32.xlu1 %v1354_v29 }
 0xa38   :  { %1449 = vrot.lane.b32.xlu1 %v2199_v37, %s2089_s21 }
 0xa3c   :  { %1555 = vrot.lane.b32.xlu1 %v2289_v44, %s2075_s10 }
 0xa40   :  { %1557 = vrot.lane.b32.xlu1 %v2292_v50, %s2075_s10 }
 0xa44   :  { %1565 = vrot.lane.b32.xlu1 %v1189_v24, %s2090_s22 }
 0xaa7   :  { %v1353_v36 = vpop.xlane.xlu0 %1352 }
 0xaa8   :  { %v1357_v30 = vsub.f32 %v1349_v21, %v1353_v36 }
 0xaaa   :  { %v1359_v31 = vmul.f32 1.442695, %v1357_v30 }
 0xaac   :  { %1946 = vpow2.f32 %v1359_v31 }
 0xab4   :  { %v1356_v32 = vpop.xlane.xlu1 %1355 }
 0xab5   :  { %v1358_v34 = vsub.f32 %v1350_v27, %v1356_v32 }
 0xab6   :  { %v1947_v35 = vpop.eup %1946 }
 0xab7   :  { %v1361_v39 = vmul.f32 1.442695, %v1358_v34  ;;  %v1363_v40 = vsel %vm201_vm2, %v1947_v35, 0.0 }
 0xab8   :  { %1364 = vadd.xlane.f32.xlu0 %v1363_v40  ;;  %v1450_v37 = vpop.permute.xlu1 %1449 }
 0xab9   :  { %1948 = vpow2.f32 %v1361_v39  ;;  %1865 = vmatpush3.msra.mxu1 %v1450_v37 }
 0xabc   :  { %v1556_v60 = vpop.permute.xlu1 %1555 }
 0xac0   :  { %v1558_v62 = vpop.permute.xlu1 %1557 }
 0xac1   :  { %v1578_v4 = vsel %vm201_vm2, %v2254_v13, %v1558_v62 }
 0xac3   :  { %v1949_v41 = vpop.eup %1948 }
 0xac4   :  { %v1366_v43 = vsel %vm201_vm2, %v1949_v41, 0.0 }
 0xac5   :  { %1367 = vadd.xlane.f32.xlu0 %v1366_v43 }
 0xadb   :  { %1373 = vrot.lane.b32.xlu0 %v2202_v38, %s2089_s21  ;;  %v1585_v38 = vld [vmem:[#allocation7 + $0x10] sm:$0xff] }
 0xadc   :  { %v1892_v55 = vpack.c.bf16 %v1586_v54, %v1585_v38 }
 0xadf   :  { %1563 = vrot.lane.b32.xlu0 %v1113_v18, %s2090_s22 }
 0xb45   :  { %v1365_v44 = vpop.xlane.xlu0 %1364 }
 0xb46   :  { %1950 = vrcp.f32 %v1365_v44 }
 0xb50   :  { %v1951_v46 = vpop.eup %1950 }
 0xb51   :  { %v1370_v47 = vmul.f32 %v1951_v46, %v1947_v35 }
 0xb52   :  { %v1368_v45 = vpop.xlane.xlu0 %1367 }
 0xb53   :  { %1952 = vrcp.f32 %v1368_v45 }
 0xb56   :  { %v1374_v48 = vpop.permute.xlu0 %1373 }
 0xb57   :  { %1860 = vmatpush3.msra.mxu0 %v1374_v48 }
 0xb58   :  { %1862 = vmatmul.mubr.msk.f32.vlgmr.msra.gmra.mrb[12].mxu0 %vm201_vm2, %v1370_v47  ;;  %1889 = vmatprep.subr.bf16.mxu0 %v1888_v53 }
 0xb59   :  { %1891 = vmatpush3.bf16.msra.mxu0 %v1888_v53 }
 0xb5a   :  { %1893 = vmatprep.subr.bf16.mxu0 %v1892_v55  ;;  %v1564_v61 = vpop.permute.xlu0 %1563 }
 0xb5d   :  { %v1953_v49 = vpop.eup %1952  ;;  %1895 = vmatpush3.bf16.msra.mxu0 %v1892_v55 }
 0xb5e   :  { %v1372_v50 = vmul.f32 %v1953_v49, %v1949_v41 }
 0xb60   :  { %1867 = vmatmul.mubr.msk.f32.vlgmr.msra.gmra.mrb[18].mxu1 %vm201_vm2, %v1372_v50 }
 0xc2b   :  { %v1445_v56 = vpop.f32.mrb[12].mxu0 }
 0xc2c   :  { %1571 = vrot.lane.b32.xlu0 %v1445_v56, %s2091_s23  ;;  %v1863_v57 = vpop.f32.mrb[13].mxu0 }
 0xc30   :  { %1525 = vrot.lane.b32.xlu0 %v2267_v33, %s2075_s10  ;;  %v1577_v33 = vsel %vm201_vm2, %v2252_v11, %v1556_v60 }
 0xc31   :  { %v1579_v63 = vsel %vm1545_vm4, %v1577_v33, %v1564_v61 }
 0xc33   :  { %v1521_v58 = vpop.f32.mrb[18].mxu1 }
 0xc34   :  { %1531 = vrot.lane.b32.xlu0 %v2305_v8, %s2090_s22  ;;  %1573 = vrot.lane.b32.xlu1 %v1521_v58, %s2091_s23  ;;  %v1868_v59 = vpop.f32.mrb[19].mxu1 }
 0xc38   :  { %1537 = vrot.lane.b32.xlu0 %v1370_v47, %s2091_s23  ;;  %1527 = vrot.lane.b32.xlu1 %v2278_v42, %s2075_s10  ;;  %v1566_v42 = vpop.permute.xlu1 %1565 }
 0xc39   :  { %v1580_v6 = vsel %vm1545_vm4, %v1578_v4, %v1566_v42 }
 0xc3c   :  { %1533 = vrot.lane.b32.xlu1 %v2316_v16, %s2090_s22 }
 0xc40   :  { %1539 = vrot.lane.b32.xlu1 %v1372_v50, %s2091_s23 }
 0xc9e   :  { %v1572_v0 = vpop.permute.xlu0 %1571 }
 0xc9f   :  { %v1581_v1 = vsel %vm1548_vm3, %v1579_v63, %v1572_v0 }
 0xca0   :  { %1877 = vmatprep.mubr.msk.f32.mxu0 %vm67_vm0, %v1581_v1 }
 0xca2   :  { %v1526_v2 = vpop.permute.xlu0 %1525 }
 0xca3   :  { %v1543_v11 = vsel %vm201_vm2, %v2233_v3, %v1526_v2 }
 0xca6   :  { %v1532_v7 = vpop.permute.xlu0 %1531  ;;  %v1574_v8 = vpop.permute.xlu1 %1573 }
 0xca7   :  { %v1582_v9 = vsel %vm1548_vm3, %v1580_v6, %v1574_v8  ;;  %v1546_v10 = vsel %vm1545_vm4, %v1543_v11, %v1532_v7 }
 0xca8   :  { %1878 = vmatmul.mubr.msk.f32.vlgmr.msra.gmra.mrb[14].mxu0 %vm67_vm0, %v1582_v9 }
 0xcaa   :  { %v1538_v12 = vpop.permute.xlu0 %1537  ;;  %v1528_v14 = vpop.permute.xlu1 %1527 }
 0xcab   :  { %v1549_v15 = vsel %vm1548_vm3, %v1546_v10, %v1538_v12  ;;  %v1544_v16 = vsel %vm201_vm2, %v2239_v5, %v1528_v14 }
 0xcac   :  { %1551 = vst.msk [vmem:[#allocation9] sm:$0xff] %vm67_vm0, %v1549_v15 }
 0xcae   :  { %v1534_v13 = vpop.permute.xlu1 %1533 }
 0xcaf   :  { %v1547_v17 = vsel %vm1545_vm4, %v1544_v16, %v1534_v13 }
 0xcb2   :  { %v1540_v18 = vpop.permute.xlu1 %1539 }
 0xcb3   :  { %v1550_v19 = vsel %vm1548_vm3, %v1547_v17, %v1540_v18 }
 0xcb4   :  { %1552 = vst.msk [vmem:[#allocation9 + $0x8] sm:$0xff] %vm67_vm0, %v1550_v19 }
 0xcb5   :  { %2031 = shalt.err (!%p2028_p0)
}
 0xcb6   :  { %s2032_s30 = scalar_lea.hbm %s2407_s6, 256 }
 0xcb7   :  { %p2033_p1 = scmp.ne.s32.totalorder %s2407_s6, %s2032_s30  ;;  %p2036_p2 = scmp.lt.u32.totalorder %s2032_s30, %s2407_s6 }
 0xcb9   :  { %p2038_p3 = pnand %p2036_p2, %p2033_p1 }
 0xcbb   :  { %2041 = shalt.err (!%p2038_p3)
}
 0xcbc   :  { %1693 = dma.vmem_to_hbm [thread:$0]  %s1688_s26, 256, %s2407_s6, [#allocation10], %s2074_s9, %s2074_s9, %s2075_s10  }
 0xcbd   :  { %s2093_s12 = smov [#allocation8]  }
 0xcbe   :  { %s1675_s13 = sshll.u32 %s2093_s12, 4  ;;  %s1676_s13 = int_to_ptr.vmem [resolvable:$true] %s1675_s13 }
 0xcbf   :  { %s2042_s1 = scalar_lea.vmem %s1676_s13, 256  ;;  %p2047_p5 = scmp.lt.s32.totalorder %s1676_s13, %s1676_s13 }
 0xcc0   :  { %p2043_p4 = scmp.ne.s32.totalorder %s1676_s13, %s2042_s1  ;;  %p2048_p6 = scmp.lt.s32.totalorder %s2042_s1, %s2042_s1 }
 0xcc2   :  { %p2049_p7 = por %p2048_p6, %p2047_p5 }
 0xcc4   :  { %p2050_p8 = pnand %p2049_p7, %p2043_p4 }
 0xd7b   :  { %v1879_v3 = vpop.f32.mrb[14].mxu0 }
 0xd7c   :  { %1669 = vst.msk [vmem:[#allocation8 + $0x8] sm:$0xff] %vm67_vm0, %v1879_v3  ;;  %v1659_v5 = vpop.f32.mrb[15].mxu0 }
 0xd7d   :  { %1668 = vst.msk [vmem:[#allocation8] sm:$0xff] %vm67_vm0, %v1659_v5 }
 0xd7e   :  { %2053 = shalt.err (!%p2050_p8)
}
 0xd7f   :  { %s2054_s6 = scalar_lea.hbm %s2406_s5, 256 }
 0xd80   :  { %p2055_p9 = scmp.ne.s32.totalorder %s2406_s5, %s2054_s6  ;;  %p2058_p10 = scmp.lt.u32.totalorder %s2054_s6, %s2406_s5 }
 0xd82   :  { %p2060_p11 = pnand %p2058_p10, %p2055_p9 }
 0xd84   :  { %2063 = shalt.err (!%p2060_p11)
}
 0xd85   :  { %1681 = dma.vmem_to_hbm [thread:$0]  %s1676_s13, 256, %s2406_s5, [#allocation4], %s2074_s9, %s2074_s9, %s2075_s10  }
 0xd86   :  { %2068 = dma.done.wait [#allocation4], 256  }
 0xd87   :  { %2069 = vsyncadd [#allocation4], 4294967040 }
 0xd88   :  { %2070 = dma.done.wait [#allocation10], 256  }
 0xd89   :  { %2071 = vsyncadd [#allocation10], 4294967040 }
 0xd8a   :  { %1700 = vsyncpa [#allocation3], 1 }
 0xd8b   :  { %1701 = vsyncpa [#allocation6], 1 }
 0xd8c   :  { %1702 = vsyncpa [#allocation4], 1 }
 0xd8d   :  { %1703 = vsyncpa [#allocation10], 1 }

</bundles_post_ra>
